<compile_context>
chip_gen: v7x
topology: tpu7x:2x2x1
jax: 0.10.0
libtpu: 0.0.40
codegen_flags: <defaults>
</compile_context>

<pallas_src>
import functools

import jax
import jax.numpy as jnp
from jax.experimental import pallas as pl
from jax.experimental.pallas import tpu as pltpu


def hcnn_kernel(h0_ref, a_t_ref, x_ref,
                exp_ref, st_ref, dl_ref, fc_ref, fs_ref,
                *, seq_len, horizon, n_obs, n_hid):
    """One (batch-slice of the) HCNN rollout, fully VMEM/vreg resident.

    x_ref: lane-packed zero-padded observation window (B, seq_len*n_hid).
    Outputs: lane-packed slabs (B, steps*feat), reshaped in the wrapper.
    """
    A_T = a_t_ref[...]                                   # (n_hid, n_hid), pre-transposed
    B = x_ref.shape[0]

    # One bulk lane-dense load of the whole window; per-step access is a static
    # lane slice of this vreg-resident value (no per-step sublane-strided loads).
    x_all = x_ref[...]                                   # (B, seq_len*n_hid)

    # Loop-invariant teacher-forcing lane mask (first n_obs lanes), hoisted.
    lane = jax.lax.broadcasted_iota(jnp.int32, (B, n_hid), 1)
    tf_mask = lane < n_obs

    state = jnp.broadcast_to(h0_ref[...], (B, n_hid)).astype(jnp.float32)

    # Lane-packed output slabs, grown along the lane axis: only the slab + the
    # current fragments stay live (no T-deep list of vreg fragments, no stack
    # relayout); one bulk store per output ref at the end.
    st_slab = state
    exp_slab = None
    dl_slab = None

    # TODO(synk): hold A_T in the MXU weight/staging registers across the whole
    #             recurrence (pltpu.matmul_push_rhs / matmul_acc_lhs / matmul_pop)
    #             to shave the per-step RHS push off the serial critical path.
    # TODO(synk): for long seq_len replace the Python unroll with
    #             lax.fori_loop(..., unroll=4..8) + pl.ds lane-slice stores into
    #             the output refs (caps vreg pressure and compile time).
    for t in range(seq_len - 1):
        obs_pad = x_all[:, t * n_hid:(t + 1) * n_hid]    # (B, n_hid), zeros past n_obs
        y_hat = state[:, :n_obs]                         # == state @ ConMat.T
        delta = obs_pad[:, :n_obs] - y_hat               # y_true - y_hat (VPU sub)
        exp_slab = y_hat if exp_slab is None else jnp.concatenate([exp_slab, y_hat], axis=1)
        dl_slab = delta if dl_slab is None else jnp.concatenate([dl_slab, delta], axis=1)
        r = jnp.where(tf_mask, obs_pad, state)           # == state + delta @ ConMat
        # TODO(synk): optionally cast tanh(r)/A_T to bf16 for a single-pass MXU
        #             matmul — kept f32 so the 1e-5 self-test tolerance holds.
        state = jnp.dot(jnp.tanh(r), A_T,                # tanh(r) @ A.T  (one MXU op / step)
                        preferred_element_type=jnp.float32)
        st_slab = jnp.concatenate([st_slab, state], axis=1)

    exp_slab = jnp.concatenate([exp_slab, state[:, :n_obs]], axis=1)
    # Last delta row stays zero: mirrors PyTorch's zero-init (never computed there).
    dl_slab = jnp.concatenate([dl_slab, jnp.zeros((B, n_obs), jnp.float32)], axis=1)

    # Autoregressive forecast (no teacher forcing).
    # NOTE: PyTorch has a stale-index bug when forecast_horizon == 1; here any
    # horizon >= 1 is handled cleanly (forecast[i] = future_state[i] @ ConMat.T).
    fs_slab = state
    fc_slab = None
    fstate = state
    for _ in range(1, horizon):
        fc = fstate[:, :n_obs]
        fc_slab = fc if fc_slab is None else jnp.concatenate([fc_slab, fc], axis=1)
        fstate = jnp.dot(jnp.tanh(fstate), A_T, preferred_element_type=jnp.float32)
        fs_slab = jnp.concatenate([fs_slab, fstate], axis=1)
    fc_last = fstate[:, :n_obs]
    fc_slab = fc_last if fc_slab is None else jnp.concatenate([fc_slab, fc_last], axis=1)

    # One lane-dense bulk store per output ref.
    exp_ref[...] = exp_slab
    st_ref[...] = st_slab
    dl_ref[...] = dl_slab
    fc_ref[...] = fc_slab
    fs_ref[...] = fs_slab


def _tensorcores_per_chip():
    """Best-effort detection: v7x exposes 2 TensorCores per chip; v5e/v6e have 1."""
    try:
        kind = jax.devices()[0].device_kind.lower()
    except Exception:
        return 1
    return 2 if "v7" in kind else 1


def vanilla_model_forward(data_window, h0, conmat, A, forecast_horizon=None,
                          split_batch_across_cores=None):
    Bt, T, n_obs = data_window.shape
    n_hid = A.shape[0]
    assert n_hid >= n_obs and T >= 2
    H = int(forecast_horizon) if forecast_horizon else 1

    # Correctness guard: the kernel exploits the *fixed* connector ConMat = [I | 0]
    # (registered buffer of the cell) and does not ship `conmat` into the kernel.
    expected_conmat = jnp.concatenate(
        [jnp.eye(n_obs, dtype=jnp.float32),
         jnp.zeros((n_obs, n_hid - n_obs), jnp.float32)], axis=1)
    try:
        conmat_ok = bool(jnp.allclose(conmat.astype(jnp.float32), expected_conmat))
    except Exception:            # abstract tracer under jit — skip the concrete check
        conmat_ok = True
    assert conmat_ok, "kernel assumes the fixed connector ConMat == [I | 0]"

    x = data_window.astype(jnp.float32)
    # Zero-pad observations to n_hid and lane-pack time: (Bt, T*n_hid).
    xpack = jnp.pad(x, ((0, 0), (0, 0), (0, n_hid - n_obs))).reshape(Bt, T * n_hid)
    A_T = jnp.transpose(A.astype(jnp.float32))           # hoist transpose out of the loop
    h0f = h0.astype(jnp.float32)

    kern = functools.partial(hcnn_kernel, seq_len=T, horizon=H,
                             n_obs=n_obs, n_hid=n_hid)

    # Lane-dense, lane-packed outputs (reshaped to (B, time, feat) below).
    out_shapes = (
        jax.ShapeDtypeStruct((Bt, T * n_obs), jnp.float32),   # expectations
        jax.ShapeDtypeStruct((Bt, T * n_hid), jnp.float32),   # states
        jax.ShapeDtypeStruct((Bt, T * n_obs), jnp.float32),   # delta_terms
        jax.ShapeDtypeStruct((Bt, H * n_obs), jnp.float32),   # forecasts
        jax.ShapeDtypeStruct((Bt, H * n_hid), jnp.float32),   # future_states
    )

    steps = (T - 1) + (H - 1)
    cost = pl.CostEstimate(
        flops=2 * Bt * n_hid * n_hid * max(steps, 1),
        transcendentals=Bt * n_hid * max(steps, 1),
        bytes_accessed=4 * (n_hid + n_hid * n_hid + Bt * T * n_hid
                            + Bt * (2 * T * n_obs + T * n_hid + H * n_obs + H * n_hid)),
    )

    if split_batch_across_cores is None:
        split_batch_across_cores = (Bt > 1) and (_tensorcores_per_chip() > 1)

    # TODO(synk): if the caller has many windows, fuse them into one call with a
    #             larger batch (MXU is <1% utilized at B=2; throughput is ~free).
    if split_batch_across_cores:
        # v7x: batch rows are independent recurrences — a "parallel" batch grid
        # shards them across the two TensorCores.  Not used on 1-TC v5e/v6e,
        # where the grid would just be a serial loop with per-step overhead.
        outs = pl.pallas_call(
            kern,
            out_shape=out_shapes,
            grid=(Bt,),
            in_specs=[pl.BlockSpec((1, n_hid), lambda b: (0, 0)),
                      pl.BlockSpec((n_hid, n_hid), lambda b: (0, 0)),
                      pl.BlockSpec((1, T * n_hid), lambda b: (b, 0))],
            out_specs=(pl.BlockSpec((1, T * n_obs), lambda b: (b, 0)),
                       pl.BlockSpec((1, T * n_hid), lambda b: (b, 0)),
                       pl.BlockSpec((1, T * n_obs), lambda b: (b, 0)),
                       pl.BlockSpec((1, H * n_obs), lambda b: (b, 0)),
                       pl.BlockSpec((1, H * n_hid), lambda b: (b, 0))),
            compiler_params=pltpu.CompilerParams(
                dimension_semantics=("parallel",)),
            cost_estimate=cost,
        )(h0f, A_T, xpack)
    else:
        # Single grid point: everything resident in VMEM (trivial at these shapes).
        # TODO(synk): at production n_hid, budget A_T (n_hid^2 * 4 B) against the
        #             scoped VMEM limit (raise vmem_limit_bytes / store A in bf16
        #             on v7x's 64 MiB VMEM).
        vmem = pl.BlockSpec(memory_space=pltpu.MemorySpace.VMEM)
        outs = pl.pallas_call(
            kern,
            out_shape=out_shapes,
            in_specs=[vmem, vmem, vmem],
            out_specs=(vmem,) * 5,
            cost_estimate=cost,
        )(h0f, A_T, xpack)

    exps = outs[0].reshape(Bt, T, n_obs)
    states = outs[1].reshape(Bt, T, n_hid)
    deltas = outs[2].reshape(Bt, T, n_obs)
    if forecast_horizon:
        fcs = outs[3].reshape(Bt, H, n_obs)
        fss = outs[4].reshape(Bt, H, n_hid)
        return exps, states, deltas, fcs, fss
    return exps, states, deltas, None, None


def _reference(data_window, h0, conmat, A, horizon):
    # pure-JAX reference mirroring the PyTorch loop (explicit ConMat matmuls).
    Bt, T, n_obs = data_window.shape
    n_hid = A.shape[0]
    exps = jnp.zeros((Bt, T, n_obs)); sts = jnp.zeros((Bt, T, n_hid))
    dls = jnp.zeros((Bt, T, n_obs))
    state = jnp.broadcast_to(h0, (Bt, n_hid))
    sts = sts.at[:, 0].set(state)
    for t in range(T - 1):
        y_hat = state @ conmat.T
        delta = data_window[:, t] - y_hat
        state = jnp.tanh(state + delta @ conmat) @ A.T
        exps = exps.at[:, t].set(y_hat); dls = dls.at[:, t].set(delta)
        sts = sts.at[:, t + 1].set(state)
    exps = exps.at[:, T - 1].set(state @ conmat.T)
    fcs = jnp.zeros((Bt, horizon, n_obs)); fss = jnp.zeros((Bt, horizon, n_hid))
    fss = fss.at[:, 0].set(state)
    fstate = state
    for t in range(1, horizon):
        fcs = fcs.at[:, t - 1].set(fstate @ conmat.T)
        fstate = jnp.tanh(fstate) @ A.T
        fss = fss.at[:, t].set(fstate)
    fcs = fcs.at[:, horizon - 1].set(fstate @ conmat.T)
    return exps, sts, dls, fcs, fss


if __name__ == "__main__":
    # small shapes consistent with the module's forward
    batch, seq_len, n_obs, n_hid, horizon = 2, 8, 4, 32, 4
    lo, hi = -0.75, 0.75

    key = jax.random.PRNGKey(0)
    k_a, k_h0, k_x = jax.random.split(key, 3)

    # deterministic parameter init (synthetic, no checkpoint load)
    A = jax.random.uniform(k_a, (n_hid, n_hid), jnp.float32, lo, hi)
    h0 = jax.random.uniform(k_h0, (1, n_hid), jnp.float32, lo, hi)    # s0_nature='random_'
    conmat = jnp.concatenate(
        [jnp.eye(n_obs, dtype=jnp.float32),
         jnp.zeros((n_obs, n_hid - n_obs), jnp.float32)], axis=1)      # ConMat = [I | 0]
    data_window = jax.random.normal(k_x, (batch, seq_len, n_obs), jnp.float32)

    outs = vanilla_model_forward(data_window, h0, conmat, A, forecast_horizon=horizon)
    outs = jax.block_until_ready(outs)

    refs = _reference(data_window, h0, conmat, A, horizon)
    for o, r in zip(outs, refs):
        assert jnp.allclose(o, r, atol=1e-5, rtol=1e-5), "mismatch vs reference"

    print("KERNEL_OK")
</pallas_src>

<mosaic_0001>
module attributes {stable_mosaic.version = 11 : i64} {
  func.func @hcnn_kernel(%arg0: memref<1x32xf32, #tpu.memory_space<vmem>>, %arg1: memref<32x32xf32, #tpu.memory_space<vmem>>, %arg2: memref<2x256xf32, #tpu.memory_space<vmem>>, %arg3: memref<2x32xf32, #tpu.memory_space<vmem>>, %arg4: memref<2x256xf32, #tpu.memory_space<vmem>>, %arg5: memref<2x32xf32, #tpu.memory_space<vmem>>, %arg6: memref<2x16xf32, #tpu.memory_space<vmem>>, %arg7: memref<2x128xf32, #tpu.memory_space<vmem>>) attributes {dimension_semantics = [], scalar_prefetch = 0 : i64, scratch_operands = 0 : i64, tpu.core_type = #tpu.core_type<tc>} {
    %c0 = arith.constant 0 : index
    %c0_0 = arith.constant 0 : index
    %0 = vector.load %arg1[%c0, %c0_0] : memref<32x32xf32, #tpu.memory_space<vmem>>, vector<32x32xf32>
    %c0_1 = arith.constant 0 : index
    %c0_2 = arith.constant 0 : index
    %1 = vector.load %arg2[%c0_1, %c0_2] : memref<2x256xf32, #tpu.memory_space<vmem>>, vector<2x256xf32>
    %2 = tpu.iota {dimensions = array<i32: 1>} : vector<2x32xi32>
    %c4_i32 = arith.constant 4 : i32
    %3 = vector.broadcast %c4_i32 : i32 to vector<2x32xi32>
    %4 = arith.cmpi slt, %2, %3 : vector<2x32xi32>
    %c0_3 = arith.constant 0 : index
    %c0_4 = arith.constant 0 : index
    %5 = vector.load %arg0[%c0_3, %c0_4] : memref<1x32xf32, #tpu.memory_space<vmem>>, vector<1x32xf32>
    %6 = vector.shape_cast %5 : vector<1x32xf32> to vector<1x32xf32>
    %7 = vector.broadcast %6 : vector<1x32xf32> to vector<2x32xf32>
    %8 = vector.extract_strided_slice %1 {offsets = [0, 0], sizes = [2, 32], strides = [1, 1]} : vector<2x256xf32> to vector<2x32xf32>
    %9 = vector.extract_strided_slice %7 {offsets = [0, 0], sizes = [2, 4], strides = [1, 1]} : vector<2x32xf32> to vector<2x4xf32>
    %10 = vector.extract_strided_slice %8 {offsets = [0, 0], sizes = [2, 4], strides = [1, 1]} : vector<2x32xf32> to vector<2x4xf32>
    %11 = arith.subf %10, %9 : vector<2x4xf32>
    %12 = arith.select %4, %8, %7 : vector<2x32xi1>, vector<2x32xf32>
    %13 = math.tanh %12 : vector<2x32xf32>
    %cst = arith.constant dense<0.000000e+00> : vector<2x32xf32>
    %14 = tpu.matmul %13, %0, %cst {dimension_numbers = #tpu.dot_dimension_numbers<[1], [0], [0], [1], [0, 0, 1, 1], [], []>} : vector<2x32xf32>, vector<32x32xf32>, vector<2x32xf32> -> vector<2x32xf32>
    %15 = tpu.concatenate %7, %14 in 1 : vector<2x32xf32>, vector<2x32xf32> -> vector<2x64xf32>
    %16 = vector.extract_strided_slice %1 {offsets = [0, 32], sizes = [2, 32], strides = [1, 1]} : vector<2x256xf32> to vector<2x32xf32>
    %17 = vector.extract_strided_slice %14 {offsets = [0, 0], sizes = [2, 4], strides = [1, 1]} : vector<2x32xf32> to vector<2x4xf32>
    %18 = vector.extract_strided_slice %16 {offsets = [0, 0], sizes = [2, 4], strides = [1, 1]} : vector<2x32xf32> to vector<2x4xf32>
    %19 = arith.subf %18, %17 : vector<2x4xf32>
    %20 = tpu.concatenate %9, %17 in 1 : vector<2x4xf32>, vector<2x4xf32> -> vector<2x8xf32>
    %21 = tpu.concatenate %11, %19 in 1 : vector<2x4xf32>, vector<2x4xf32> -> vector<2x8xf32>
    %22 = arith.select %4, %16, %14 : vector<2x32xi1>, vector<2x32xf32>
    %23 = math.tanh %22 : vector<2x32xf32>
    %cst_5 = arith.constant dense<0.000000e+00> : vector<2x32xf32>
    %24 = tpu.matmul %23, %0, %cst_5 {dimension_numbers = #tpu.dot_dimension_numbers<[1], [0], [0], [1], [0, 0, 1, 1], [], []>} : vector<2x32xf32>, vector<32x32xf32>, vector<2x32xf32> -> vector<2x32xf32>
    %25 = tpu.concatenate %15, %24 in 1 : vector<2x64xf32>, vector<2x32xf32> -> vector<2x96xf32>
    %26 = vector.extract_strided_slice %1 {offsets = [0, 64], sizes = [2, 32], strides = [1, 1]} : vector<2x256xf32> to vector<2x32xf32>
    %27 = vector.extract_strided_slice %24 {offsets = [0, 0], sizes = [2, 4], strides = [1, 1]} : vector<2x32xf32> to vector<2x4xf32>
    %28 = vector.extract_strided_slice %26 {offsets = [0, 0], sizes = [2, 4], strides = [1, 1]} : vector<2x32xf32> to vector<2x4xf32>
    %29 = arith.subf %28, %27 : vector<2x4xf32>
    %30 = tpu.concatenate %20, %27 in 1 : vector<2x8xf32>, vector<2x4xf32> -> vector<2x12xf32>
    %31 = tpu.concatenate %21, %29 in 1 : vector<2x8xf32>, vector<2x4xf32> -> vector<2x12xf32>
    %32 = arith.select %4, %26, %24 : vector<2x32xi1>, vector<2x32xf32>
    %33 = math.tanh %32 : vector<2x32xf32>
    %cst_6 = arith.constant dense<0.000000e+00> : vector<2x32xf32>
    %34 = tpu.matmul %33, %0, %cst_6 {dimension_numbers = #tpu.dot_dimension_numbers<[1], [0], [0], [1], [0, 0, 1, 1], [], []>} : vector<2x32xf32>, vector<32x32xf32>, vector<2x32xf32> -> vector<2x32xf32>
    %35 = tpu.concatenate %25, %34 in 1 : vector<2x96xf32>, vector<2x32xf32> -> vector<2x128xf32>
    %36 = vector.extract_strided_slice %1 {offsets = [0, 96], sizes = [2, 32], strides = [1, 1]} : vector<2x256xf32> to vector<2x32xf32>
    %37 = vector.extract_strided_slice %34 {offsets = [0, 0], sizes = [2, 4], strides = [1, 1]} : vector<2x32xf32> to vector<2x4xf32>
    %38 = vector.extract_strided_slice %36 {offsets = [0, 0], sizes = [2, 4], strides = [1, 1]} : vector<2x32xf32> to vector<2x4xf32>
    %39 = arith.subf %38, %37 : vector<2x4xf32>
    %40 = tpu.concatenate %30, %37 in 1 : vector<2x12xf32>, vector<2x4xf32> -> vector<2x16xf32>
    %41 = tpu.concatenate %31, %39 in 1 : vector<2x12xf32>, vector<2x4xf32> -> vector<2x16xf32>
    %42 = arith.select %4, %36, %34 : vector<2x32xi1>, vector<2x32xf32>
    %43 = math.tanh %42 : vector<2x32xf32>
    %cst_7 = arith.constant dense<0.000000e+00> : vector<2x32xf32>
    %44 = tpu.matmul %43, %0, %cst_7 {dimension_numbers = #tpu.dot_dimension_numbers<[1], [0], [0], [1], [0, 0, 1, 1], [], []>} : vector<2x32xf32>, vector<32x32xf32>, vector<2x32xf32> -> vector<2x32xf32>
    %45 = tpu.concatenate %35, %44 in 1 : vector<2x128xf32>, vector<2x32xf32> -> vector<2x160xf32>
    %46 = vector.extract_strided_slice %1 {offsets = [0, 128], sizes = [2, 32], strides = [1, 1]} : vector<2x256xf32> to vector<2x32xf32>
    %47 = vector.extract_strided_slice %44 {offsets = [0, 0], sizes = [2, 4], strides = [1, 1]} : vector<2x32xf32> to vector<2x4xf32>
    %48 = vector.extract_strided_slice %46 {offsets = [0, 0], sizes = [2, 4], strides = [1, 1]} : vector<2x32xf32> to vector<2x4xf32>
    %49 = arith.subf %48, %47 : vector<2x4xf32>
    %50 = tpu.concatenate %40, %47 in 1 : vector<2x16xf32>, vector<2x4xf32> -> vector<2x20xf32>
    %51 = tpu.concatenate %41, %49 in 1 : vector<2x16xf32>, vector<2x4xf32> -> vector<2x20xf32>
    %52 = arith.select %4, %46, %44 : vector<2x32xi1>, vector<2x32xf32>
    %53 = math.tanh %52 : vector<2x32xf32>
    %cst_8 = arith.constant dense<0.000000e+00> : vector<2x32xf32>
    %54 = tpu.matmul %53, %0, %cst_8 {dimension_numbers = #tpu.dot_dimension_numbers<[1], [0], [0], [1], [0, 0, 1, 1], [], []>} : vector<2x32xf32>, vector<32x32xf32>, vector<2x32xf32> -> vector<2x32xf32>
    %55 = tpu.concatenate %45, %54 in 1 : vector<2x160xf32>, vector<2x32xf32> -> vector<2x192xf32>
    %56 = vector.extract_strided_slice %1 {offsets = [0, 160], sizes = [2, 32], strides = [1, 1]} : vector<2x256xf32> to vector<2x32xf32>
    %57 = vector.extract_strided_slice %54 {offsets = [0, 0], sizes = [2, 4], strides = [1, 1]} : vector<2x32xf32> to vector<2x4xf32>
    %58 = vector.extract_strided_slice %56 {offsets = [0, 0], sizes = [2, 4], strides = [1, 1]} : vector<2x32xf32> to vector<2x4xf32>
    %59 = arith.subf %58, %57 : vector<2x4xf32>
    %60 = tpu.concatenate %50, %57 in 1 : vector<2x20xf32>, vector<2x4xf32> -> vector<2x24xf32>
    %61 = tpu.concatenate %51, %59 in 1 : vector<2x20xf32>, vector<2x4xf32> -> vector<2x24xf32>
    %62 = arith.select %4, %56, %54 : vector<2x32xi1>, vector<2x32xf32>
    %63 = math.tanh %62 : vector<2x32xf32>
    %cst_9 = arith.constant dense<0.000000e+00> : vector<2x32xf32>
    %64 = tpu.matmul %63, %0, %cst_9 {dimension_numbers = #tpu.dot_dimension_numbers<[1], [0], [0], [1], [0, 0, 1, 1], [], []>} : vector<2x32xf32>, vector<32x32xf32>, vector<2x32xf32> -> vector<2x32xf32>
    %65 = tpu.concatenate %55, %64 in 1 : vector<2x192xf32>, vector<2x32xf32> -> vector<2x224xf32>
    %66 = vector.extract_strided_slice %1 {offsets = [0, 192], sizes = [2, 32], strides = [1, 1]} : vector<2x256xf32> to vector<2x32xf32>
    %67 = vector.extract_strided_slice %64 {offsets = [0, 0], sizes = [2, 4], strides = [1, 1]} : vector<2x32xf32> to vector<2x4xf32>
    %68 = vector.extract_strided_slice %66 {offsets = [0, 0], sizes = [2, 4], strides = [1, 1]} : vector<2x32xf32> to vector<2x4xf32>
    %69 = arith.subf %68, %67 : vector<2x4xf32>
    %70 = tpu.concatenate %60, %67 in 1 : vector<2x24xf32>, vector<2x4xf32> -> vector<2x28xf32>
    %71 = tpu.concatenate %61, %69 in 1 : vector<2x24xf32>, vector<2x4xf32> -> vector<2x28xf32>
    %72 = arith.select %4, %66, %64 : vector<2x32xi1>, vector<2x32xf32>
    %73 = math.tanh %72 : vector<2x32xf32>
    %cst_10 = arith.constant dense<0.000000e+00> : vector<2x32xf32>
    %74 = tpu.matmul %73, %0, %cst_10 {dimension_numbers = #tpu.dot_dimension_numbers<[1], [0], [0], [1], [0, 0, 1, 1], [], []>} : vector<2x32xf32>, vector<32x32xf32>, vector<2x32xf32> -> vector<2x32xf32>
    %75 = tpu.concatenate %65, %74 in 1 : vector<2x224xf32>, vector<2x32xf32> -> vector<2x256xf32>
    %76 = vector.extract_strided_slice %74 {offsets = [0, 0], sizes = [2, 4], strides = [1, 1]} : vector<2x32xf32> to vector<2x4xf32>
    %77 = tpu.concatenate %70, %76 in 1 : vector<2x28xf32>, vector<2x4xf32> -> vector<2x32xf32>
    %cst_11 = arith.constant 0.000000e+00 : f32
    %78 = vector.broadcast %cst_11 : f32 to vector<2x4xf32>
    %79 = tpu.concatenate %71, %78 in 1 : vector<2x28xf32>, vector<2x4xf32> -> vector<2x32xf32>
    %80 = vector.extract_strided_slice %74 {offsets = [0, 0], sizes = [2, 4], strides = [1, 1]} : vector<2x32xf32> to vector<2x4xf32>
    %81 = math.tanh %74 : vector<2x32xf32>
    %cst_12 = arith.constant dense<0.000000e+00> : vector<2x32xf32>
    %82 = tpu.matmul %81, %0, %cst_12 {dimension_numbers = #tpu.dot_dimension_numbers<[1], [0], [0], [1], [0, 0, 1, 1], [], []>} : vector<2x32xf32>, vector<32x32xf32>, vector<2x32xf32> -> vector<2x32xf32>
    %83 = tpu.concatenate %74, %82 in 1 : vector<2x32xf32>, vector<2x32xf32> -> vector<2x64xf32>
    %84 = vector.extract_strided_slice %82 {offsets = [0, 0], sizes = [2, 4], strides = [1, 1]} : vector<2x32xf32> to vector<2x4xf32>
    %85 = tpu.concatenate %80, %84 in 1 : vector<2x4xf32>, vector<2x4xf32> -> vector<2x8xf32>
    %86 = math.tanh %82 : vector<2x32xf32>
    %cst_13 = arith.constant dense<0.000000e+00> : vector<2x32xf32>
    %87 = tpu.matmul %86, %0, %cst_13 {dimension_numbers = #tpu.dot_dimension_numbers<[1], [0], [0], [1], [0, 0, 1, 1], [], []>} : vector<2x32xf32>, vector<32x32xf32>, vector<2x32xf32> -> vector<2x32xf32>
    %88 = tpu.concatenate %83, %87 in 1 : vector<2x64xf32>, vector<2x32xf32> -> vector<2x96xf32>
    %89 = vector.extract_strided_slice %87 {offsets = [0, 0], sizes = [2, 4], strides = [1, 1]} : vector<2x32xf32> to vector<2x4xf32>
    %90 = tpu.concatenate %85, %89 in 1 : vector<2x8xf32>, vector<2x4xf32> -> vector<2x12xf32>
    %91 = math.tanh %87 : vector<2x32xf32>
    %cst_14 = arith.constant dense<0.000000e+00> : vector<2x32xf32>
    %92 = tpu.matmul %91, %0, %cst_14 {dimension_numbers = #tpu.dot_dimension_numbers<[1], [0], [0], [1], [0, 0, 1, 1], [], []>} : vector<2x32xf32>, vector<32x32xf32>, vector<2x32xf32> -> vector<2x32xf32>
    %93 = tpu.concatenate %88, %92 in 1 : vector<2x96xf32>, vector<2x32xf32> -> vector<2x128xf32>
    %94 = vector.extract_strided_slice %92 {offsets = [0, 0], sizes = [2, 4], strides = [1, 1]} : vector<2x32xf32> to vector<2x4xf32>
    %95 = tpu.concatenate %90, %94 in 1 : vector<2x12xf32>, vector<2x4xf32> -> vector<2x16xf32>
    %c0_15 = arith.constant 0 : index
    %c0_16 = arith.constant 0 : index
    %96 = vector.load %arg3[%c0_15, %c0_16] : memref<2x32xf32, #tpu.memory_space<vmem>>, vector<2x32xf32>
    tpu.vector_store %arg3[%c0_15, %c0_16], %77 {strides = array<i32>} : memref<2x32xf32, #tpu.memory_space<vmem>>, vector<2x32xf32>,
    %c0_17 = arith.constant 0 : index
    %c0_18 = arith.constant 0 : index
    %97 = vector.load %arg4[%c0_17, %c0_18] : memref<2x256xf32, #tpu.memory_space<vmem>>, vector<2x256xf32>
    tpu.vector_store %arg4[%c0_17, %c0_18], %75 {strides = array<i32>} : memref<2x256xf32, #tpu.memory_space<vmem>>, vector<2x256xf32>,
    %c0_19 = arith.constant 0 : index
    %c0_20 = arith.constant 0 : index
    %98 = vector.load %arg5[%c0_19, %c0_20] : memref<2x32xf32, #tpu.memory_space<vmem>>, vector<2x32xf32>
    tpu.vector_store %arg5[%c0_19, %c0_20], %79 {strides = array<i32>} : memref<2x32xf32, #tpu.memory_space<vmem>>, vector<2x32xf32>,
    %c0_21 = arith.constant 0 : index
    %c0_22 = arith.constant 0 : index
    %99 = vector.load %arg6[%c0_21, %c0_22] : memref<2x16xf32, #tpu.memory_space<vmem>>, vector<2x16xf32>
    tpu.vector_store %arg6[%c0_21, %c0_22], %95 {strides = array<i32>} : memref<2x16xf32, #tpu.memory_space<vmem>>, vector<2x16xf32>,
    %c0_23 = arith.constant 0 : index
    %c0_24 = arith.constant 0 : index
    %100 = vector.load %arg7[%c0_23, %c0_24] : memref<2x128xf32, #tpu.memory_space<vmem>>, vector<2x128xf32>
    tpu.vector_store %arg7[%c0_23, %c0_24], %93 {strides = array<i32>} : memref<2x128xf32, #tpu.memory_space<vmem>>, vector<2x128xf32>,
    return
  }
}

</mosaic_0001>

<bundles_post_ra>
// kernel: tpu_custom_call.1
= control target key start
LH: loop header
LB: loop body
LE: loop exit
PB: predicated region body
PF: predicated region fallthrough
CT: control target
= control target key end

     0   :  { %13 = vsyncpa [#allocation3], 0  ;;  %s1941_s0 = inlined_call_operand.hbm [shape: f32[1,32], index: 0, kind: input, shape index: {}]   ;;  %s1942_s1 = inlined_call_operand.hbm [shape: f32[32,32], index: 1, kind: input, shape index: {}]   ;;  %s1943_s2 = inlined_call_operand.vmem [shape: f32[2,256], index: 2, kind: input, shape index: {}]   ;;  %s1944_s3 = inlined_call_operand.hbm [shape: f32[2,32], index: 3, kind: output, shape index: {0}]   ;;  %s1945_s4 = inlined_call_operand.hbm [shape: f32[2,256], index: 4, kind: output, shape index: {1}]   ;;  %s1946_s5 = inlined_call_operand.hbm [shape: f32[2,32], index: 5, kind: output, shape index: {2}]   ;;  %s1947_s6 = inlined_call_operand.hbm [shape: f32[2,16], index: 6, kind: output, shape index: {3}]   ;;  %s1948_s7 = inlined_call_operand.hbm [shape: f32[2,128], index: 7, kind: output, shape index: {4}]  }
   0x1   :  { %14 = vsyncpa [#allocation6], 0 }
   0x2   :  { %15 = vsyncpa [#allocation4], 0 }
   0x3   :  { %16 = vsyncpa [#allocation9], 0 }
   0x4   :  { %17 = vsyncpa [#allocation12], 0  ;;  %s1580_s24 = smov [#allocation2]   ;;  %s1581_s26 = smov [#allocation5]  }
   0x5   :  { %s24_s25 = sshll.u32 %s1580_s24, 4  ;;  %s33_s27 = sshll.u32 %s1581_s26, 4  ;;  %s25_s25 = int_to_ptr.vmem [resolvable:$true] %s24_s25  ;;  %s1645_s27 = int_to_ptr.vmem [resolvable:$true] %s33_s27 }
   0x6   :  { %s1416_s30 = scalar_lea.hbm %s1941_s0, 16 }
   0x7   :  { %p1417_p0 = scmp.ne.s32.totalorder %s1941_s0, %s1416_s30  ;;  %p1420_p1 = scmp.lt.u32.totalorder %s1416_s30, %s1941_s0 }
   0x9   :  { %p1422_p2 = pnand %p1420_p1, %p1417_p0 }
   0xb   :  { %1425 = shalt.err (!%p1422_p2)
}
   0xc   :  { %s1426_s12 = scalar_lea.vmem %s25_s25, 16  ;;  %s1430_s13 = scalar_lea.vmem %s25_s25, 32 }
   0xd   :  { %p1427_p3 = scmp.ne.s32.totalorder %s25_s25, %s1426_s12  ;;  %p1431_p4 = scmp.lt.s32.totalorder %s25_s25, %s25_s25 }
   0xe   :  { %p1432_p5 = scmp.lt.s32.totalorder %s1430_s13, %s1426_s12 }
  0x10   :  { %p1433_p6 = por %p1432_p5, %p1431_p4 }
  0x12   :  { %p1434_p7 = pnand %p1433_p6, %p1427_p3 }
  0x14   :  { %1437 = shalt.err (!%p1434_p7)
}
  0x15   :  { %27 = dma.hbm_to_vmem [thread:$0]  %s1941_s0, 16, %s25_s25, [#allocation3]  }
  0x16   :  { %s1438_s18 = scalar_lea.hbm %s1942_s1, 512 }
  0x17   :  { %p1439_p8 = scmp.ne.s32.totalorder %s1942_s1, %s1438_s18  ;;  %p1442_p9 = scmp.lt.u32.totalorder %s1438_s18, %s1942_s1 }
  0x19   :  { %p1444_p10 = pnand %p1442_p9, %p1439_p8 }
  0x1b   :  { %1447 = shalt.err (!%p1444_p10)
}
  0x1c   :  { %s1448_s23 = scalar_lea.vmem %s1645_s27, 512  ;;  %p1453_p12 = scmp.lt.s32.totalorder %s1645_s27, %s1645_s27 }
  0x1d   :  { %p1449_p11 = scmp.ne.s32.totalorder %s1645_s27, %s1448_s23  ;;  %p1454_p13 = scmp.lt.s32.totalorder %s1448_s23, %s1448_s23 }
  0x1f   :  { %p1455_p0 = por %p1454_p13, %p1453_p12 }
  0x21   :  { %p1456_p1 = pnand %p1455_p0, %p1449_p11 }
  0x23   :  { %1459 = shalt.err (!%p1456_p1)
}
  0x24   :  { %s1582_s0 = smov 128   ;;  %s1583_s24 = smov 8  }
  0x25   :  { %39 = dma.hbm_to_vmem [thread:$0]  %s1942_s1, 512, %s1645_s27, [#allocation6], %s1582_s0, %s1582_s0, %s1583_s24  }
  0x26   :  { %1570 = dma.done.wait [#allocation3], 16  }
  0x27   :  { %1571 = vsyncadd [#allocation3], 4294967280 }
  0x28   :  { %1572 = dma.done.wait [#allocation6], 512  }
  0x29   :  { %1573 = vsyncadd [#allocation6], 4294966784  ;;  %v53_v0 = vlaneseq  ;;  %v1584_v1 = vmov 0.0|0.0   ;;  %vm1585_vm0 = vmmov 0   ;;  %v1586_v2 = vmov 0.0   ;;  %v48_v9 = vld [vmem:[#allocation5] sm:$0xff] }
  0x2a   :  { %1311 = vmatprep.subr.bf16.mxu0 %v1584_v1  ;;  %1209 = vmatprep.mubr.msk.f32.mxu0 %vm1585_vm0, %v1586_v2  ;;  %v1587_v4 = vmov 1983009808   ;;  %v49_v10 = vld [vmem:[#allocation5 + $0x8] sm:$0xff]  ;;  %v50_v11 = vld [vmem:[#allocation5 + $0x10] sm:$0xff]  ;;  %v51_v13 = vld [vmem:[#allocation5 + $0x18] sm:$0xff]  ;;  %s1589_s28 = smov 32  }
  0x2b   :  { %v1680_v3 = vand.u32 127, %v53_v0  ;;  %v146_v5 = vunpack.c.l.s4 %v1587_v4  ;;  %v149_v6 = vshrl.u32 %v53_v0, 7  ;;  %1317 = vmatprep.subr.bf16.mxu1 %v1584_v1  ;;  %1220 = vmatprep.mubr.msk.f32.mxu1 %vm1585_vm0, %v1586_v2  ;;  %v1688_v12 = vpack.c.bf16 %v49_v10, %v48_v9  ;;  %v1693_v14 = vld [vmem:[%s1943_s2] sm:$0xf]  ;;  %v1695_v15 = vld [vmem:[#allocation2] ss:$0 sm:$0xff] }
  0x2c   :  { %v1704_v18 = vpack.c.bf16 %v51_v13, %v50_v11  ;;  %s1588_s2 = smov 96   ;;  %vm66_vm2 = vcmask 261120   ;;  %s1590_s29 = smov 64   ;;  %vm159_vm3 = vcmask 31744   ;;  %vm279_vm4 = vcmask 64512  }
  0x2d   :  { %v147_v7 = vunpack.c.0.s8 %v146_v5  ;;  %vm55_vm1 = vcmp.lt.s32.totalorder %v1680_v3, 4  ;;  %1313 = vmatpush3.bf16.msra.mxu0 %v1688_v12  ;;  %1319 = vmatpush3.bf16.msra.mxu1 %v1688_v12  ;;  %s1591_s30 = smov 4   ;;  %s1592_s8 = smov 72   ;;  %v483_v57 = vrot.slane %v1693_v14, 2  ;;  %vm391_vm5 = vcmask 97280  }
  0x2e   :  { %v64_v16 = vsel %vm55_vm1, %v1693_v14, %v1695_v15  ;;  %1314 = vmatprep.subr.bf16.mxu0 %v1584_v1  ;;  %1320 = vmatprep.subr.bf16.mxu1 %v1584_v1  ;;  %s1593_s9 = smov 100   ;;  %s1594_s10 = smov 12   ;;  %vm490_vm6 = vcmask 130048   ;;  %vm594_vm7 = vcmask 162816   ;;  %vm699_vm8 = vcmask 195584  }
  0x2f   :  { %v1686_v8 = vsub.s32 %v147_v7, %v149_v6  ;;  %1396 = vtanh.f32 %v64_v16  ;;  %s1595_s11 = smov 44   ;;  %s1596_s12 = smov 16   ;;  %vm799_vm9 = vcmask 228352   ;;  %vm1051_vm10 = vcmask 254976  }
  0x30   :  { %s1597_s13 = smov 20   ;;  %s1598_s14 = smov 24   ;;  %vm263_vm11 = vcmask 523264   ;;  %vm375_vm12 = vcmask 785408  }
  0x31   :  { %v180_v17 = vrot.slane %v1693_v14, %v1686_v8  ;;  %1316 = vmatpush3.bf16.msra.mxu0 %v1704_v18  ;;  %1322 = vmatpush3.bf16.msra.mxu1 %v1704_v18  ;;  %s1599_s15 = smov 28   ;;  %s1600_s16 = smov [#allocation8]  }
  0x32   :  { %1323 = vmatprep.subr.bf16.mxu0 %v1584_v1  ;;  %1329 = vmatprep.subr.bf16.mxu1 %v1584_v1  ;;  %s1085_s17 = sshll.u32 %s1600_s16, 4  ;;  %s1086_s17 = int_to_ptr.vmem [resolvable:$true] %s1085_s17 }
  0x33   :  { %181 = vrot.lane.b32.xlu0 %v180_v17, %s1588_s2  ;;  %405 = vrot.lane.b32.xlu1 %v180_v17, %s1589_s28  ;;  %v1710_v19 = vcombine.high %v180_v17, %v180_v17  ;;  %s1460_s18 = scalar_lea.vmem %s1086_s17, 64  ;;  %p1465_p3 = scmp.lt.s32.totalorder %s1086_s17, %s1086_s17 }
  0x34   :  { %p1461_p2 = scmp.ne.s32.totalorder %s1086_s17, %s1460_s18  ;;  %p1466_p4 = scmp.lt.s32.totalorder %s1460_s18, %s1460_s18 }
  0x36   :  { %p1467_p5 = por %p1466_p4, %p1465_p3 }
  0x37   :  { %608 = vrot.lane.b32.xlu1 %v1710_v19, %s1588_s2  ;;  %293 = vrot.lane.b32.xlu0 %v180_v17, %s1590_s29 }
  0x38   :  { %p1468_p6 = pnand %p1467_p5, %p1461_p2 }
  0x39   :  { %v1397_v20 = vpop.eup %1396 }
  0x3a   :  { %1210 = vmatmul.mubr.msk.f32.vlgmr.msra.gmra.mrb[0].mxu0 %vm66_vm2, %v1397_v20 }
  0x3b   :  { %1325 = vmatpush3.bf16.msra.mxu0 %v1688_v12  ;;  %1231 = vmatprep.mubr.msk.f32.mxu0 %vm1585_vm0, %v1586_v2 }
  0x3c   :  { %1326 = vmatprep.subr.bf16.mxu0 %v1584_v1  ;;  %713 = vrot.lane.b32.xlu0 %v1710_v19, %s1590_s29 }
  0x3f   :  { %1328 = vmatpush3.bf16.msra.mxu0 %v1704_v18 }
  0x40   :  { %1335 = vmatprep.subr.bf16.mxu0 %v1584_v1 }
  0xa5   :  { %v182_v21 = vpop.permute.xlu0 %181  ;;  %v406_v37 = vpop.permute.xlu1 %405 }
  0xa9   :  { %v294_v27 = vpop.permute.xlu0 %293  ;;  %v1760_v38 = vpop.permute.xlu1 %608 }
  0xae   :  { %v1755_v33 = vpop.permute.xlu0 %713 }
 0x10d   :  { %v136_v22 = vpop.f32.mrb[0].mxu0 }
 0x10e   :  { %v184_v23 = vsel %vm55_vm1, %v182_v21, %v136_v22  ;;  %v1211_v24 = vpop.f32.mrb[1].mxu0  ;;  %v151_v25 = vrot.slane %v136_v22, %v1686_v8 }
 0x10f   :  { %1398 = vtanh.f32 %v184_v23 }
 0x110   :  { %152 = vrot.lane.b32.xlu1 %v151_v25, %s1589_s28 }
 0x119   :  { %v1399_v26 = vpop.eup %1398 }
 0x11a   :  { %1221 = vmatmul.mubr.msk.f32.vlgmr.msra.gmra.mrb[0].mxu1 %vm66_vm2, %v1399_v26 }
 0x11b   :  { %1331 = vmatpush3.bf16.msra.mxu1 %v1688_v12  ;;  %1242 = vmatprep.mubr.msk.f32.mxu1 %vm1585_vm0, %v1586_v2 }
 0x11c   :  { %1332 = vmatprep.subr.bf16.mxu1 %v1584_v1 }
 0x11f   :  { %1334 = vmatpush3.bf16.msra.mxu1 %v1704_v18 }
 0x120   :  { %1341 = vmatprep.subr.bf16.mxu1 %v1584_v1 }
 0x182   :  { %v153_v43 = vpop.permute.xlu1 %152 }
 0x183   :  { %v155_v44 = vsub.f32 %v1693_v14, %v153_v43 }
 0x185   :  { %v168_v45 = vrot.slane %v155_v44, %v1686_v8 }
 0x1ed   :  { %v255_v28 = vpop.f32.mrb[0].mxu1 }
 0x1ee   :  { %v296_v29 = vsel %vm55_vm1, %v294_v27, %v255_v28  ;;  %v1222_v30 = vpop.f32.mrb[1].mxu1  ;;  %v271_v31 = vrot.slane %v255_v28, %v1686_v8 }
 0x1ef   :  { %1400 = vtanh.f32 %v296_v29 }
 0x1f0   :  { %272 = vrot.lane.b32.xlu0 %v271_v31, %s1590_s29 }
 0x1f4   :  { %586 = vrot.lane.b32.xlu0 %v1693_v14, %s1588_s2 }
 0x1f8   :  { %156 = vrot.lane.b32.xlu0 %v136_v22, %s1591_s30 }
 0x1f9   :  { %v1401_v32 = vpop.eup %1400 }
 0x1fa   :  { %1232 = vmatmul.mubr.msk.f32.vlgmr.msra.gmra.mrb[2].mxu0 %vm66_vm2, %v1401_v32  ;;  %v63_v32 = vsub.f32 %v1693_v14, %v1695_v15 }
 0x1fb   :  { %1337 = vmatpush3.bf16.msra.mxu0 %v1688_v12  ;;  %1253 = vmatprep.mubr.msk.f32.mxu0 %vm1585_vm0, %v1586_v2 }
 0x1fc   :  { %141 = vrot.lane.b32.xlu0 %v136_v22, %s1589_s28  ;;  %1338 = vmatprep.subr.bf16.mxu0 %v1584_v1 }
 0x1ff   :  { %1340 = vmatpush3.bf16.msra.mxu0 %v1704_v18 }
 0x200   :  { %1347 = vmatprep.subr.bf16.mxu0 %v1584_v1 }
 0x262   :  { %v273_v34 = vpop.permute.xlu0 %272 }
 0x263   :  { %v275_v35 = vsub.f32 %v1693_v14, %v273_v34 }
 0x265   :  { %v288_v36 = vrot.slane %v275_v35, %v1686_v8 }
 0x266   :  { %v587_v49 = vpop.permute.xlu0 %586 }
 0x267   :  { %289 = vrot.lane.b32.xlu0 %v288_v36, %s1592_s8  ;;  %v588_v7 = vrot.slane %v587_v49, 2 }
 0x26a   :  { %v157_v53 = vpop.permute.xlu0 %156 }
 0x26b   :  { %260 = vrot.lane.b32.xlu0 %v255_v28, %s1590_s29  ;;  %v160_v54 = vsel %vm159_vm3, %v1695_v15, %v157_v53 }
 0x26e   :  { %v142_v3 = vpop.permute.xlu0 %141 }
 0x2cd   :  { %v367_v39 = vpop.f32.mrb[2].mxu0 }
 0x2ce   :  { %v408_v40 = vsel %vm55_vm1, %v406_v37, %v367_v39  ;;  %372 = vrot.lane.b32.xlu0 %v367_v39, %s1588_s2  ;;  %v1233_v41 = vpop.f32.mrb[3].mxu0  ;;  %v383_v42 = vrot.slane %v367_v39, %v1686_v8 }
 0x2cf   :  { %1402 = vtanh.f32 %v408_v40 }
 0x2d0   :  { %384 = vrot.lane.b32.xlu1 %v383_v42, %s1588_s2 }
 0x2d4   :  { %691 = vrot.lane.b32.xlu1 %v1693_v14, %s1590_s29 }
 0x2d8   :  { %169 = vrot.lane.b32.xlu1 %v168_v45, %s1593_s9 }
 0x2d9   :  { %v1403_v46 = vpop.eup %1402  ;;  %v290_v29 = vpop.permute.xlu0 %289 }
 0x2da   :  { %1243 = vmatmul.mubr.msk.f32.vlgmr.msra.gmra.mrb[2].mxu1 %vm66_vm2, %v1403_v46 }
 0x2db   :  { %1343 = vmatpush3.bf16.msra.mxu1 %v1688_v12  ;;  %1264 = vmatprep.mubr.msk.f32.mxu1 %vm1585_vm0, %v1586_v2 }
 0x2dc   :  { %276 = vrot.lane.b32.xlu1 %v255_v28, %s1583_s24  ;;  %1344 = vmatprep.subr.bf16.mxu1 %v1584_v1 }
 0x2dd   :  { %v261_v30 = vpop.permute.xlu0 %260 }
 0x2df   :  { %1346 = vmatpush3.bf16.msra.mxu1 %v1704_v18 }
 0x2e0   :  { %388 = vrot.lane.b32.xlu1 %v367_v39, %s1594_s10  ;;  %1353 = vmatprep.subr.bf16.mxu1 %v1584_v1 }
 0x340   :  { %v373_v31 = vpop.permute.xlu0 %372 }
 0x342   :  { %v385_v47 = vpop.permute.xlu1 %384 }
 0x343   :  { %v387_v48 = vsub.f32 %v1693_v14, %v385_v47 }
 0x345   :  { %v400_v50 = vrot.slane %v387_v48, %v1686_v8  ;;  %v144_v48 = vsel %vm66_vm2, %v1695_v15, %v142_v3 }
 0x346   :  { %v692_v51 = vpop.permute.xlu1 %691 }
 0x347   :  { %401 = vrot.lane.b32.xlu0 %v400_v50, %s1595_s11  ;;  %v693_v22 = vrot.slane %v692_v51, 2  ;;  %v264_v50 = vsel %vm263_vm11, %v144_v48, %v261_v30 }
 0x34a   :  { %v1782_v52 = vpop.permute.xlu1 %169 }
 0x34b   :  { %v172_v34 = vsel %vm159_vm3, %v63_v32, %v1782_v52  ;;  %v376_v52 = vsel %vm375_vm12, %v264_v50, %v373_v31 }
 0x34c   :  { %v292_v37 = vsel %vm279_vm4, %v172_v34, %v290_v29 }
 0x34e   :  { %v277_v55 = vpop.permute.xlu1 %276 }
 0x34f   :  { %v280_v56 = vsel %vm279_vm4, %v160_v54, %v277_v55 }
 0x352   :  { %v389_v0 = vpop.permute.xlu1 %388 }
 0x353   :  { %v392_v4 = vsel %vm391_vm5, %v280_v56, %v389_v0 }
 0x3ad   :  { %v1788_v58 = vpop.f32.mrb[2].mxu1 }
 0x3ae   :  { %v485_v59 = vsub.f32 %v483_v57, %v1788_v58  ;;  %v506_v60 = vsel %vm55_vm1, %v1710_v19, %v1788_v58  ;;  %v1244_v61 = vpop.f32.mrb[3].mxu1  ;;  %487 = vrot.lane.b32.xlu1 %v1788_v58, %s1596_s12 }
 0x3af   :  { %1404 = vtanh.f32 %v506_v60 }
 0x3b0   :  { %v499_v62 = vrot.slane %v485_v59, %v1686_v8 }
 0x3b2   :  { %500 = vrot.lane.b32.xlu0 %v499_v62, %s1596_s12 }
 0x3b9   :  { %v1405_v63 = vpop.eup %1404 }
 0x3ba   :  { %1254 = vmatmul.mubr.msk.f32.vlgmr.msra.gmra.mrb[4].mxu0 %vm66_vm2, %v1405_v63 }
 0x3bb   :  { %1349 = vmatpush3.bf16.msra.mxu0 %v1688_v12  ;;  %1275 = vmatprep.mubr.msk.f32.mxu0 %vm1585_vm0, %v1586_v2 }
 0x3bc   :  { %1350 = vmatprep.subr.bf16.mxu0 %v1584_v1 }
 0x3bf   :  { %1352 = vmatpush3.bf16.msra.mxu0 %v1704_v18 }
 0x3c0   :  { %1359 = vmatprep.subr.bf16.mxu0 %v1584_v1 }
 0x420   :  { %v488_v5 = vpop.permute.xlu1 %487 }
 0x421   :  { %v491_v6 = vsel %vm490_vm6, %v392_v4, %v488_v5 }
 0x48d   :  { %v577_v9 = vpop.f32.mrb[4].mxu0 }
 0x48e   :  { %v590_v10 = vsub.f32 %v588_v7, %v577_v9  ;;  %v611_v11 = vsel %vm55_vm1, %v1760_v38, %v577_v9  ;;  %582 = vrot.lane.b32.xlu1 %v577_v9, %s1589_s28  ;;  %v1255_v13 = vpop.f32.mrb[5].mxu0 }
 0x48f   :  { %1406 = vtanh.f32 %v611_v11 }
 0x490   :  { %v603_v16 = vrot.slane %v590_v10, %v1686_v8 }
 0x492   :  { %591 = vrot.lane.b32.xlu1 %v577_v9, %s1597_s13  ;;  %604 = vrot.lane.b32.xlu0 %v603_v16, %s1597_s13 }
 0x499   :  { %v1407_v17 = vpop.eup %1406 }
 0x49a   :  { %1265 = vmatmul.mubr.msk.f32.vlgmr.msra.gmra.mrb[4].mxu1 %vm66_vm2, %v1407_v17 }
 0x49b   :  { %1355 = vmatpush3.bf16.msra.mxu1 %v1688_v12  ;;  %1286 = vmatprep.mubr.msk.f32.mxu1 %vm1585_vm0, %v1586_v2 }
 0x49c   :  { %1356 = vmatprep.subr.bf16.mxu1 %v1584_v1 }
 0x49f   :  { %1358 = vmatpush3.bf16.msra.mxu1 %v1704_v18 }
 0x4a0   :  { %1365 = vmatprep.subr.bf16.mxu1 %v1584_v1 }
 0x500   :  { %v583_v19 = vpop.permute.xlu1 %582 }
 0x501   :  { %v585_v49 = vsel %vm66_vm2, %v1788_v58, %v583_v19 }
 0x504   :  { %v592_v20 = vpop.permute.xlu1 %591 }
 0x505   :  { %v595_v21 = vsel %vm594_vm7, %v491_v6, %v592_v20 }
 0x56d   :  { %v682_v23 = vpop.f32.mrb[4].mxu1 }
 0x56e   :  { %v695_v24 = vsub.f32 %v693_v22, %v682_v23  ;;  %v716_v25 = vsel %vm55_vm1, %v1755_v33, %v682_v23  ;;  %687 = vrot.lane.b32.xlu1 %v682_v23, %s1590_s29  ;;  %v1266_v26 = vpop.f32.mrb[5].mxu1 }
 0x56f   :  { %1408 = vtanh.f32 %v716_v25 }
 0x570   :  { %v708_v27 = vrot.slane %v695_v24, %v1686_v8  ;;  %v402_v8 = vpop.permute.xlu0 %401 }
 0x571   :  { %v404_v38 = vsel %vm391_vm5, %v292_v37, %v402_v8 }
 0x572   :  { %696 = vrot.lane.b32.xlu1 %v682_v23, %s1598_s14  ;;  %709 = vrot.lane.b32.xlu0 %v708_v27, %s1598_s14 }
 0x574   :  { %v501_v33 = vpop.permute.xlu0 %500 }
 0x575   :  { %v503_v39 = vsel %vm490_vm6, %v404_v38, %v501_v33 }
 0x578   :  { %v605_v35 = vpop.permute.xlu0 %604 }
 0x579   :  { %v1409_v28 = vpop.eup %1408  ;;  %v607_v40 = vsel %vm594_vm7, %v503_v39, %v605_v35 }
 0x57a   :  { %1276 = vmatmul.mubr.msk.f32.vlgmr.msra.gmra.mrb[6].mxu0 %vm66_vm2, %v1409_v28 }
 0x57b   :  { %1361 = vmatpush3.bf16.msra.mxu0 %v1688_v12  ;;  %1297 = vmatprep.mubr.msk.f32.mxu0 %vm1585_vm0, %v1586_v2 }
 0x57c   :  { %1362 = vmatprep.subr.bf16.mxu0 %v1584_v1 }
 0x57f   :  { %1364 = vmatpush3.bf16.msra.mxu0 %v1704_v18 }
 0x5e0   :  { %v688_v36 = vpop.permute.xlu1 %687 }
 0x5e1   :  { %v690_v51 = vsel %vm263_vm11, %v585_v49, %v688_v36 }
 0x5e4   :  { %v697_v41 = vpop.permute.xlu1 %696  ;;  %v710_v42 = vpop.permute.xlu0 %709 }
 0x5e5   :  { %v700_v14 = vsel %vm699_vm8, %v595_v21, %v697_v41  ;;  %v712_v43 = vsel %vm699_vm8, %v607_v40, %v710_v42 }
 0x5e6   :  { %v801_v44 = vsel %vm799_vm9, %v712_v43, 0.0 }
 0x5e7   :  { %1065 = vst.msk [vmem:[#allocation10] sm:$0x3] %vm1051_vm10, %v801_v44 }
 0x64d   :  { %v1840_v45 = vpop.f32.mrb[6].mxu0 }
 0x64e   :  { %1410 = vtanh.f32 %v1840_v45  ;;  %792 = vrot.lane.b32.xlu1 %v1840_v45, %s1588_s2  ;;  %v1277_v46 = vpop.f32.mrb[7].mxu0 }
 0x658   :  { %v1411_v47 = vpop.eup %1410 }
 0x659   :  { %1287 = vmatmul.mubr.msk.f32.vlgmr.msra.gmra.mrb[6].mxu1 %vm66_vm2, %v1411_v47 }
 0x65a   :  { %1367 = vmatpush3.bf16.msra.mxu1 %v1688_v12  ;;  %1308 = vmatprep.mubr.msk.f32.mxu1 %vm1585_vm0, %v1586_v2 }
 0x65b   :  { %1368 = vmatprep.subr.bf16.mxu1 %v1584_v1 }
 0x65e   :  { %1370 = vmatpush3.bf16.msra.mxu1 %v1704_v18 }
 0x6c0   :  { %v793_v12 = vpop.permute.xlu1 %792 }
 0x6c1   :  { %v795_v2 = vsel %vm375_vm12, %v690_v51, %v793_v12 }
 0x6c2   :  { %v1055_v1 = vcombine.low %v376_v52, %v795_v2 }
 0x6c4   :  { %1150 = vst.sshfl [vmem:[#allocation8] sm:$0x33 pattern:$0x76325410] %v1055_v1 }
 0x72c   :  { %v872_v18 = vpop.f32.mrb[6].mxu1 }
 0x72d   :  { %1412 = vtanh.f32 %v872_v18  ;;  %877 = vrot.lane.b32.xlu1 %v872_v18, %s1589_s28  ;;  %881 = vrot.lane.b32.xlu0 %v872_v18, %s1591_s30  ;;  %v1288_v15 = vpop.f32.mrb[7].mxu1 }
 0x737   :  { %v1413_v53 = vpop.eup %1412 }
 0x738   :  { %1298 = vmatmul.mubr.msk.f32.vlgmr.msra.gmra.mrb[8].mxu0 %vm66_vm2, %v1413_v53 }
 0x79f   :  { %v878_v57 = vpop.permute.xlu1 %877 }
 0x7a0   :  { %v880_v58 = vsel %vm66_vm2, %v1840_v45, %v878_v57 }
 0x80b   :  { %v955_v54 = vpop.f32.mrb[8].mxu0 }
 0x80c   :  { %1414 = vtanh.f32 %v955_v54  ;;  %960 = vrot.lane.b32.xlu1 %v955_v54, %s1590_s29  ;;  %964 = vrot.lane.b32.xlu0 %v955_v54, %s1583_s24  ;;  %v1299_v55 = vpop.f32.mrb[9].mxu0 }
 0x810   :  { %796 = vrot.lane.b32.xlu1 %v1840_v45, %s1599_s15 }
 0x816   :  { %v1415_v56 = vpop.eup %1414 }
 0x817   :  { %1309 = vmatmul.mubr.msk.f32.vlgmr.msra.gmra.mrb[8].mxu1 %vm66_vm2, %v1415_v56 }
 0x87e   :  { %v961_v59 = vpop.permute.xlu1 %960 }
 0x87f   :  { %v1869_v60 = vsel %vm263_vm11, %v880_v58, %v961_v59 }
 0x882   :  { %v797_v61 = vpop.permute.xlu1 %796 }
 0x883   :  { %v800_v62 = vsel %vm799_vm9, %v700_v14, %v797_v61 }
 0x884   :  { %1052 = vst.msk [vmem:[#allocation7] sm:$0x3] %vm1051_vm10, %v800_v62 }
 0x885   :  { %1471 = shalt.err (!%p1468_p6)
}
 0x886   :  { %s1472_s21 = scalar_lea.hbm %s1945_s4, 64 }
 0x887   :  { %p1473_p7 = scmp.ne.s32.totalorder %s1945_s4, %s1472_s21  ;;  %p1476_p8 = scmp.lt.u32.totalorder %s1472_s21, %s1945_s4 }
 0x889   :  { %p1478_p9 = pnand %p1476_p8, %p1473_p7 }
 0x88b   :  { %1481 = shalt.err (!%p1478_p9)
}
 0x88c   :  { %1088 = dma.vmem_to_hbm [thread:$0]  %s1086_s17, 64, %s1945_s4, [#allocation9]  }
 0x88d   :  { %s1601_s1 = smov [#allocation7]   ;;  %s1602_s28 = smov [#allocation10]  }
 0x88e   :  { %s1075_s27 = sshll.u32 %s1601_s1, 4  ;;  %s1095_s29 = sshll.u32 %s1602_s28, 4  ;;  %s1076_s27 = int_to_ptr.vmem [resolvable:$true] %s1075_s27  ;;  %s1096_s29 = int_to_ptr.vmem [resolvable:$true] %s1095_s29 }
 0x88f   :  { %s1482_s30 = scalar_lea.vmem %s1076_s27, 32  ;;  %p1487_p11 = scmp.lt.s32.totalorder %s1076_s27, %s1076_s27 }
 0x890   :  { %p1483_p10 = scmp.ne.s32.totalorder %s1076_s27, %s1482_s30  ;;  %p1488_p12 = scmp.lt.s32.totalorder %s1482_s30, %s1482_s30 }
 0x892   :  { %p1489_p13 = por %p1488_p12, %p1487_p11 }
 0x894   :  { %p1490_p0 = pnand %p1489_p13, %p1483_p10 }
 0x896   :  { %1493 = shalt.err (!%p1490_p0)
}
 0x897   :  { %s1494_s11 = scalar_lea.hbm %s1944_s3, 32 }
 0x898   :  { %p1495_p1 = scmp.ne.s32.totalorder %s1944_s3, %s1494_s11  ;;  %p1498_p2 = scmp.lt.u32.totalorder %s1494_s11, %s1944_s3 }
 0x89a   :  { %p1500_p3 = pnand %p1498_p2, %p1495_p1 }
 0x89c   :  { %1503 = shalt.err (!%p1500_p3)
}
 0x89d   :  { %1078 = dma.vmem_to_hbm [thread:$0]  %s1076_s27, 32, %s1944_s3, [#allocation4]  }
 0x89e   :  { %s1504_s17 = scalar_lea.vmem %s1096_s29, 32  ;;  %p1509_p5 = scmp.lt.s32.totalorder %s1096_s29, %s1096_s29 }
 0x89f   :  { %p1505_p4 = scmp.ne.s32.totalorder %s1096_s29, %s1504_s17  ;;  %p1510_p6 = scmp.lt.s32.totalorder %s1504_s17, %s1504_s17 }
 0x8a1   :  { %p1511_p7 = por %p1510_p6, %p1509_p5 }
 0x8a3   :  { %p1512_p8 = pnand %p1511_p7, %p1505_p4 }
 0x8a5   :  { %1515 = shalt.err (!%p1512_p8)
}
 0x8a6   :  { %s1516_s20 = scalar_lea.hbm %s1946_s5, 32 }
 0x8a7   :  { %p1517_p9 = scmp.ne.s32.totalorder %s1946_s5, %s1516_s20  ;;  %p1520_p10 = scmp.lt.u32.totalorder %s1516_s20, %s1946_s5 }
 0x8a9   :  { %p1522_p11 = pnand %p1520_p10, %p1517_p9 }
 0x8ab   :  { %1525 = shalt.err (!%p1522_p11)
}
 0x8ac   :  { %1098 = dma.vmem_to_hbm [thread:$0]  %s1096_s29, 32, %s1946_s5, [#allocation9]   ;;  %v882_v4 = vpop.permute.xlu0 %881  ;;  %vm1066_vm13 = vcmask 123904  }
 0x8ad   :  { %s1603_s25 = smov [#allocation11]   ;;  %v884_v6 = vsel %vm159_vm3, %v1840_v45, %v882_v4  ;;  %s1604_s5 = smov [#allocation13]  }
 0x8ae   :  { %s1105_s26 = sshll.u32 %s1603_s25, 4  ;;  %s1115_s1 = sshll.u32 %s1604_s5, 4  ;;  %s1106_s26 = int_to_ptr.vmem [resolvable:$true] %s1105_s26  ;;  %s1116_s1 = int_to_ptr.vmem [resolvable:$true] %s1115_s1 }
 0x8af   :  { %p1531_p13 = scmp.lt.s32.totalorder %s1106_s26, %s1106_s26 }
 0x8b0   :  { %v965_v5 = vpop.permute.xlu0 %964 }
 0x8b1   :  { %v967_v7 = vsel %vm279_vm4, %v884_v6, %v965_v5 }
 0x8ea   :  { %v1038_v63 = vpop.f32.mrb[8].mxu1 }
 0x8eb   :  { %1047 = vrot.lane.b32.xlu0 %v1038_v63, %s1594_s10  ;;  %v1310_v0 = vpop.f32.mrb[9].mxu1  ;;  %s1526_s10 = scalar_lea.vmem %s1106_s26, 32 }
 0x8ec   :  { %p1527_p12 = scmp.ne.s32.totalorder %s1106_s26, %s1526_s10  ;;  %p1532_p0 = scmp.lt.s32.totalorder %s1526_s10, %s1526_s10 }
 0x8ee   :  { %p1533_p1 = por %p1532_p0, %p1531_p13 }
 0x8ef   :  { %1043 = vrot.lane.b32.xlu0 %v1038_v63, %s1588_s2 }
 0x8f0   :  { %p1534_p2 = pnand %p1533_p1, %p1527_p12 }
 0x95d   :  { %v1048_v9 = vpop.permute.xlu0 %1047 }
 0x95e   :  { %v1050_v10 = vsel %vm391_vm5, %v967_v7, %v1048_v9 }
 0x95f   :  { %1067 = vst.msk [vmem:[#allocation11] sm:$0x3] %vm1066_vm13, %v1050_v10 }
 0x960   :  { %1537 = shalt.err (!%p1534_p2)
}
 0x961   :  { %s1538_s28 = scalar_lea.hbm %s1947_s6, 32 }
 0x962   :  { %p1539_p3 = scmp.ne.s32.totalorder %s1947_s6, %s1538_s28  ;;  %p1542_p4 = scmp.lt.u32.totalorder %s1538_s28, %s1947_s6 }
 0x964   :  { %p1544_p5 = pnand %p1542_p4, %p1539_p3 }
 0x966   :  { %1547 = shalt.err (!%p1544_p5)
}
 0x967   :  { %1108 = dma.vmem_to_hbm [thread:$0]  %s1106_s26, 32, %s1947_s6, [#allocation12]   ;;  %v1044_v11 = vpop.permute.xlu0 %1043 }
 0x968   :  { %v1046_v13 = vsel %vm375_vm12, %v1869_v60, %v1044_v11  ;;  %s1548_s13 = scalar_lea.vmem %s1116_s1, 32  ;;  %p1553_p7 = scmp.lt.s32.totalorder %s1116_s1, %s1116_s1 }
 0x969   :  { %1068 = vst [vmem:[#allocation13] sm:$0x3] %v1046_v13  ;;  %p1549_p6 = scmp.ne.s32.totalorder %s1116_s1, %s1548_s13  ;;  %p1554_p8 = scmp.lt.s32.totalorder %s1548_s13, %s1548_s13 }
 0x96b   :  { %p1555_p9 = por %p1554_p8, %p1553_p7 }
 0x96d   :  { %p1556_p10 = pnand %p1555_p9, %p1549_p6 }
 0x96f   :  { %1559 = shalt.err (!%p1556_p10)
}
 0x970   :  { %s1560_s15 = scalar_lea.hbm %s1948_s7, 32 }
 0x971   :  { %p1561_p11 = scmp.ne.s32.totalorder %s1948_s7, %s1560_s15  ;;  %p1564_p12 = scmp.lt.u32.totalorder %s1560_s15, %s1948_s7 }
 0x973   :  { %p1566_p13 = pnand %p1564_p12, %p1561_p11 }
 0x975   :  { %1569 = shalt.err (!%p1566_p13)
}
 0x976   :  { %1118 = dma.vmem_to_hbm [thread:$0]  %s1116_s1, 32, %s1948_s7, [#allocation12]  }
 0x977   :  { %1574 = dma.done.wait [#allocation4], 32  }
 0x978   :  { %1575 = vsyncadd [#allocation4], 4294967264 }
 0x979   :  { %1576 = dma.done.wait [#allocation9], 96  }
 0x97a   :  { %1577 = vsyncadd [#allocation9], 4294967200 }
 0x97b   :  { %1578 = dma.done.wait [#allocation12], 64  }
 0x97c   :  { %1579 = vsyncadd [#allocation12], 4294967232 }
 0x97d   :  { %1134 = vsyncpa [#allocation3], 1 }
 0x97e   :  { %1135 = vsyncpa [#allocation6], 1 }
 0x97f   :  { %1136 = vsyncpa [#allocation4], 1 }
 0x980   :  { %1137 = vsyncpa [#allocation9], 1 }
 0x981   :  { %1138 = vsyncpa [#allocation12], 1 }

</bundles_post_ra>
